<compile_context>
chip_gen: v7x
topology: tpu7x:2x2x1
jax: 0.10.0
libtpu: 0.0.40
codegen_flags: <defaults>
</compile_context>

<pallas_src>
import functools
import math

import jax
import jax.numpy as jnp
from jax import lax
from jax.experimental import pallas as pl
from jax.experimental.pallas import tpu as pltpu


def _round_up(x: int, m: int) -> int:
    return ((x + m - 1) // m) * m


# --------------------------------------------------------------------------- #
# Kernel                                                                      #
# --------------------------------------------------------------------------- #
def _make_kernel(action_dim: int, std: float):
    """Kernel closed over the static action dim and action std."""
    inv_std = 1.0 / std
    logp_const = math.log(std) + 0.5 * math.log(2.0 * math.pi)

    def kernel(xa_ref, w1_ref, b1_ref, w2_ref, b2_ref, w3_ref, b3_ref,
               sel_ref, out_ref):
        # Fused batch slab: action in lanes [0:A), state in lanes [A:A+S).
        xa = xa_ref[...]                                     # (TB, W)

        # fused actor+critic layer 1 (action rows of w1 are zero) -> (TB, H2)
        h = jnp.tanh(jnp.dot(xa, w1_ref[...],
                             preferred_element_type=jnp.float32) + b1_ref[...])
        # fused (block-diagonal) layer 2                           -> (TB, H2)
        h = jnp.tanh(jnp.dot(h, w2_ref[...],
                             preferred_element_type=jnp.float32) + b2_ref[...])
        # fused layer 3                                            -> (TB, 128)
        #   lanes [0:A)  = actor pre-tanh output
        #   lane  A      = critic state value
        pre = jnp.dot(h, w3_ref[...],
                      preferred_element_type=jnp.float32) + b3_ref[...]

        mean = jnp.tanh(pre)                                 # actor final tanh

        # Widen the A action lanes of the narrow slab to the 128-lane output
        # slab with a tiny selector matmul (MXU slack >> unaligned lane concat).
        act = jnp.dot(xa, sel_ref[...],
                      preferred_element_type=jnp.float32)    # (TB, 128)

        z = (act - mean) * inv_std
        logp = -0.5 * z * z - logp_const

        # Pack: log_prob in actor lanes [0:A), raw value (no tanh) in lane A.
        col = lax.broadcasted_iota(jnp.int32, pre.shape, 1)
        out_ref[...] = jnp.where(col < action_dim, logp, pre)

    return kernel


# --------------------------------------------------------------------------- #
# One-time parameter preparation (transpose + pad + fuse)                     #
# --------------------------------------------------------------------------- #
def prepare_params(params, state_dim: int, hidden: int, action_dim: int):
    """Builds the fused, lane-packed (in, out) weight stack. Call once."""
    A, S, h = action_dim, state_dim, hidden
    AP = 128                                    # output slab width
    assert A + 1 <= AP, "action_dim + 1 must fit in one 128-lane slab"
    W = _round_up(A + S, 8)                     # fused batch-slab width
    H2 = _round_up(2 * h, 128)                  # fused hidden width (128 for h<=64)
    coff = H2 - h                               # critic block offset

    # layer 1: [action | state] @ w1f ; action rows are zero.
    w1f = jnp.zeros((W, H2), jnp.float32)
    w1f = w1f.at[A:A + S, :h].set(params["w1a"].T)
    w1f = w1f.at[A:A + S, coff:coff + h].set(params["w1c"].T)
    b1f = jnp.zeros((1, H2), jnp.float32)
    b1f = b1f.at[0, :h].set(params["b1a"])
    b1f = b1f.at[0, coff:coff + h].set(params["b1c"])

    # layer 2: block-diagonal (actor top-left, critic bottom-right).
    w2f = jnp.zeros((H2, H2), jnp.float32)
    w2f = w2f.at[:h, :h].set(params["w2a"].T)
    w2f = w2f.at[coff:coff + h, coff:coff + h].set(params["w2c"].T)
    b2f = jnp.zeros((1, H2), jnp.float32)
    b2f = b2f.at[0, :h].set(params["b2a"])
    b2f = b2f.at[0, coff:coff + h].set(params["b2c"])

    # layer 3: actor head -> lanes [0:A), critic head -> lane A.
    w3f = jnp.zeros((H2, AP), jnp.float32)
    w3f = w3f.at[:h, :A].set(params["w3a"].T)
    w3f = w3f.at[coff:coff + h, A:A + 1].set(params["w3c"].T)
    b3f = jnp.zeros((1, AP), jnp.float32)
    b3f = b3f.at[0, :A].set(params["b3a"])
    b3f = b3f.at[0, A].set(params["b3c"][0])

    # selector: copies action lanes [0:A) of the slab into output lanes [0:A).
    sel = jnp.zeros((W, AP), jnp.float32)
    sel = sel.at[jnp.arange(A), jnp.arange(A)].set(1.0)

    return dict(w1f=w1f, b1f=b1f, w2f=w2f, b2f=b2f, w3f=w3f, b3f=b3f, sel=sel)


# --------------------------------------------------------------------------- #
# Wrapper                                                                     #
# --------------------------------------------------------------------------- #
@functools.partial(jax.jit, static_argnames=("std", "action_dim", "tile"))
def actor_critic_evaluate(state, action, prepared, *, std, action_dim, tile=1024):
    """Returns (action_logprobs (B,A), state_value (B,), dist_entropy (B,A))."""
    B, S = state.shape
    A = action_dim
    w1f, b1f = prepared["w1f"], prepared["b1f"]
    w2f, b2f = prepared["w2f"], prepared["b2f"]
    w3f, b3f = prepared["w3f"], prepared["b3f"]
    sel = prepared["sel"]
    W, H2 = w1f.shape
    AP = w3f.shape[1]

    # Batch tile: multiple of 8 sublanes, at least 2 grid steps when possible
    # (both v7x TensorCores get work), capped at `tile` rows. VMEM use at
    # TB=1024 is only a few MB -- far below any generation's limit.
    B8 = _round_up(B, 8)
    TB = min(tile, max(8, _round_up(pl.cdiv(B8, 2), 8)))
    B_pad = _round_up(B, TB)

    # ONE narrow fused batch slab: action in lanes [0:A), state in [A:A+S).
    xa = jnp.concatenate(
        [action.astype(jnp.float32), state.astype(jnp.float32)], axis=1)
    xa_p = jnp.pad(xa, ((0, B_pad - B), (0, W - (A + S))))

    grid = (B_pad // TB,)

    def batch_spec(cols):
        return pl.BlockSpec((TB, cols), lambda i: (i, 0))

    def resident_spec(shape):
        return pl.BlockSpec(shape, lambda i: (0, 0))

    flops = 2 * B_pad * (W * H2 + H2 * H2 + H2 * AP + W * AP)
    transcendentals = B_pad * (2 * H2 + AP)           # tanh count
    bytes_accessed = 4 * (B_pad * (W + AP)
                          + W * H2 + H2 * H2 + H2 * AP + W * AP + 2 * H2 + AP)

    out = pl.pallas_call(
        _make_kernel(action_dim, std),
        out_shape=jax.ShapeDtypeStruct((B_pad, AP), jnp.float32),
        grid_spec=pltpu.PrefetchScalarGridSpec(
            num_scalar_prefetch=0,
            grid=grid,
            in_specs=[
                batch_spec(W),                  # fused (action|state) tile
                resident_spec(w1f.shape), resident_spec(b1f.shape),
                resident_spec(w2f.shape), resident_spec(b2f.shape),
                resident_spec(w3f.shape), resident_spec(b3f.shape),
                resident_spec(sel.shape),
            ],
            out_specs=batch_spec(AP),           # packed (logp | value) slab
        ),
        compiler_params=pltpu.CompilerParams(
            dimension_semantics=("parallel",)),
        cost_estimate=pl.CostEstimate(flops=flops,
                                      transcendentals=transcendentals,
                                      bytes_accessed=bytes_accessed),
    )(xa_p, w1f, b1f, w2f, b2f, w3f, b3f, sel)

    logp = out[:B, :A]
    value = out[:B, A]
    # Diagonal-Normal entropy is a compile-time constant; no HBM writeback
    # needed from the kernel.
    ent = jnp.full((B, A),
                   0.5 + 0.5 * math.log(2.0 * math.pi) + math.log(std),
                   jnp.float32)
    # TODO(synk): act() would additionally need action_mean (= tanh of lanes
    # [0:A) of `pre`); expose it via a second output slab if required.
    return logp, value, ent


# --------------------------------------------------------------------------- #
# Init + pure-JAX reference                                                   #
# --------------------------------------------------------------------------- #
def init_params(key, state_dim, hidden, action_dim):
    """Deterministic PyTorch-style (uniform +/- 1/sqrt(fan_in)) init."""
    def linear(k, fan_in, fan_out):
        k1, k2 = jax.random.split(k)
        bound = 1.0 / math.sqrt(fan_in)
        w = jax.random.uniform(k1, (fan_out, fan_in), jnp.float32, -bound, bound)
        b = jax.random.uniform(k2, (fan_out,), jnp.float32, -bound, bound)
        return w, b

    keys = jax.random.split(key, 6)
    p = {}
    p["w1a"], p["b1a"] = linear(keys[0], state_dim, hidden)
    p["w2a"], p["b2a"] = linear(keys[1], hidden, hidden)
    p["w3a"], p["b3a"] = linear(keys[2], hidden, action_dim)
    p["w1c"], p["b1c"] = linear(keys[3], state_dim, hidden)
    p["w2c"], p["b2c"] = linear(keys[4], hidden, hidden)
    p["w3c"], p["b3c"] = linear(keys[5], hidden, 1)
    return p


def _reference(state, action, params, std):
    def mlp(x, w1, b1, w2, b2, w3, b3, final_tanh):
        h = jnp.tanh(x @ w1.T + b1)
        h = jnp.tanh(h @ w2.T + b2)
        o = h @ w3.T + b3
        return jnp.tanh(o) if final_tanh else o

    mean = mlp(state, params["w1a"], params["b1a"], params["w2a"],
               params["b2a"], params["w3a"], params["b3a"], True)
    value = mlp(state, params["w1c"], params["b1c"], params["w2c"],
                params["b2c"], params["w3c"], params["b3c"], False)
    var = std * std
    logp = -((action - mean) ** 2) / (2 * var) - math.log(std) - 0.5 * math.log(2 * math.pi)
    ent = jnp.full_like(mean, 0.5 + 0.5 * math.log(2 * math.pi) + math.log(std))
    return logp, jnp.squeeze(value, -1), ent


if __name__ == "__main__":
    B, state_dim, hidden, action_dim = 2, 16, 32, 4
    action_std = 0.5

    key = jax.random.PRNGKey(0)
    k_params, k_state, k_action = jax.random.split(key, 3)
    params = init_params(k_params, state_dim, hidden, action_dim)
    prepared = prepare_params(params, state_dim, hidden, action_dim)

    state = jax.random.normal(k_state, (B, state_dim), jnp.float32)
    action = jax.random.normal(k_action, (B, action_dim), jnp.float32)

    logp, value, ent = actor_critic_evaluate(
        state, action, prepared, std=action_std, action_dim=action_dim)
    jax.block_until_ready((logp, value, ent))

    r_logp, r_value, r_ent = _reference(state, action, params, action_std)
    assert jnp.allclose(logp, r_logp, atol=3e-5), "log_prob mismatch"
    assert jnp.allclose(value, r_value, atol=3e-5), "value mismatch"
    assert jnp.allclose(ent, r_ent, atol=3e-5), "entropy mismatch"

    print("KERNEL_OK")
</pallas_src>

<mosaic_0001>
module attributes {stable_mosaic.version = 11 : i64} {
  func.func @kernel(%arg0: i32, %arg1: memref<8x24xf32, #tpu.memory_space<vmem>>, %arg2: memref<24x128xf32, #tpu.memory_space<vmem>>, %arg3: memref<1x128xf32, #tpu.memory_space<vmem>>, %arg4: memref<128x128xf32, #tpu.memory_space<vmem>>, %arg5: memref<1x128xf32, #tpu.memory_space<vmem>>, %arg6: memref<128x128xf32, #tpu.memory_space<vmem>>, %arg7: memref<1x128xf32, #tpu.memory_space<vmem>>, %arg8: memref<24x128xf32, #tpu.memory_space<vmem>>, %arg9: memref<8x128xf32, #tpu.memory_space<vmem>>) attributes {dimension_semantics = [#tpu.dimension_semantics<parallel>], iteration_bounds = array<i64: 1>, scalar_prefetch = 0 : i64, scratch_operands = 0 : i64, tpu.core_type = #tpu.core_type<tc>, window_params = [{transform_indices = @transform_0, window_bounds = array<i64: 8, 24>}, {pipeline_mode = #tpu.pipeline_mode<synchronous>, transform_indices = @transform_1, window_bounds = array<i64: 24, 128>}, {pipeline_mode = #tpu.pipeline_mode<synchronous>, transform_indices = @transform_2, window_bounds = array<i64: 1, 128>}, {pipeline_mode = #tpu.pipeline_mode<synchronous>, transform_indices = @transform_3, window_bounds = array<i64: 128, 128>}, {pipeline_mode = #tpu.pipeline_mode<synchronous>, transform_indices = @transform_4, window_bounds = array<i64: 1, 128>}, {pipeline_mode = #tpu.pipeline_mode<synchronous>, transform_indices = @transform_5, window_bounds = array<i64: 128, 128>}, {pipeline_mode = #tpu.pipeline_mode<synchronous>, transform_indices = @transform_6, window_bounds = array<i64: 1, 128>}, {pipeline_mode = #tpu.pipeline_mode<synchronous>, transform_indices = @transform_7, window_bounds = array<i64: 24, 128>}, {transform_indices = @transform_8, window_bounds = array<i64: 8, 128>}]} {
    %c0 = arith.constant 0 : index
    %c0_0 = arith.constant 0 : index
    %0 = vector.load %arg1[%c0, %c0_0] : memref<8x24xf32, #tpu.memory_space<vmem>>, vector<8x24xf32>
    %c0_1 = arith.constant 0 : index
    %c0_2 = arith.constant 0 : index
    %1 = vector.load %arg2[%c0_1, %c0_2] : memref<24x128xf32, #tpu.memory_space<vmem>>, vector<24x128xf32>
    %cst = arith.constant dense<0.000000e+00> : vector<8x128xf32>
    %2 = tpu.matmul %0, %1, %cst {dimension_numbers = #tpu.dot_dimension_numbers<[1], [0], [0], [1], [0, 0, 1, 1], [], []>} : vector<8x24xf32>, vector<24x128xf32>, vector<8x128xf32> -> vector<8x128xf32>
    %c0_3 = arith.constant 0 : index
    %c0_4 = arith.constant 0 : index
    %3 = vector.load %arg3[%c0_3, %c0_4] : memref<1x128xf32, #tpu.memory_space<vmem>>, vector<1x128xf32>
    %4 = vector.broadcast %3 : vector<1x128xf32> to vector<8x128xf32>
    %5 = arith.addf %2, %4 : vector<8x128xf32>
    %6 = math.tanh %5 : vector<8x128xf32>
    %c0_5 = arith.constant 0 : index
    %c0_6 = arith.constant 0 : index
    %7 = vector.load %arg4[%c0_5, %c0_6] : memref<128x128xf32, #tpu.memory_space<vmem>>, vector<128x128xf32>
    %cst_7 = arith.constant dense<0.000000e+00> : vector<8x128xf32>
    %8 = tpu.matmul %6, %7, %cst_7 {dimension_numbers = #tpu.dot_dimension_numbers<[1], [0], [0], [1], [0, 0, 1, 1], [], []>} : vector<8x128xf32>, vector<128x128xf32>, vector<8x128xf32> -> vector<8x128xf32>
    %c0_8 = arith.constant 0 : index
    %c0_9 = arith.constant 0 : index
    %9 = vector.load %arg5[%c0_8, %c0_9] : memref<1x128xf32, #tpu.memory_space<vmem>>, vector<1x128xf32>
    %10 = vector.broadcast %9 : vector<1x128xf32> to vector<8x128xf32>
    %11 = arith.addf %8, %10 : vector<8x128xf32>
    %12 = math.tanh %11 : vector<8x128xf32>
    %c0_10 = arith.constant 0 : index
    %c0_11 = arith.constant 0 : index
    %13 = vector.load %arg6[%c0_10, %c0_11] : memref<128x128xf32, #tpu.memory_space<vmem>>, vector<128x128xf32>
    %cst_12 = arith.constant dense<0.000000e+00> : vector<8x128xf32>
    %14 = tpu.matmul %12, %13, %cst_12 {dimension_numbers = #tpu.dot_dimension_numbers<[1], [0], [0], [1], [0, 0, 1, 1], [], []>} : vector<8x128xf32>, vector<128x128xf32>, vector<8x128xf32> -> vector<8x128xf32>
    %c0_13 = arith.constant 0 : index
    %c0_14 = arith.constant 0 : index
    %15 = vector.load %arg7[%c0_13, %c0_14] : memref<1x128xf32, #tpu.memory_space<vmem>>, vector<1x128xf32>
    %16 = vector.broadcast %15 : vector<1x128xf32> to vector<8x128xf32>
    %17 = arith.addf %14, %16 : vector<8x128xf32>
    %18 = math.tanh %17 : vector<8x128xf32>
    %c0_15 = arith.constant 0 : index
    %c0_16 = arith.constant 0 : index
    %19 = vector.load %arg8[%c0_15, %c0_16] : memref<24x128xf32, #tpu.memory_space<vmem>>, vector<24x128xf32>
    %cst_17 = arith.constant dense<0.000000e+00> : vector<8x128xf32>
    %20 = tpu.matmul %0, %19, %cst_17 {dimension_numbers = #tpu.dot_dimension_numbers<[1], [0], [0], [1], [0, 0, 1, 1], [], []>} : vector<8x24xf32>, vector<24x128xf32>, vector<8x128xf32> -> vector<8x128xf32>
    %21 = arith.subf %20, %18 : vector<8x128xf32>
    %cst_18 = arith.constant 2.000000e+00 : f32
    %22 = vector.broadcast %cst_18 : f32 to vector<8x128xf32>
    %23 = arith.mulf %21, %22 : vector<8x128xf32>
    %cst_19 = arith.constant -5.000000e-01 : f32
    %24 = vector.broadcast %cst_19 : f32 to vector<8x128xf32>
    %25 = arith.mulf %24, %23 : vector<8x128xf32>
    %26 = arith.mulf %25, %23 : vector<8x128xf32>
    %cst_20 = arith.constant 0.22579135 : f32
    %27 = vector.broadcast %cst_20 : f32 to vector<8x128xf32>
    %28 = arith.subf %26, %27 : vector<8x128xf32>
    %29 = tpu.iota {dimensions = array<i32: 1>} : vector<8x128xi32>
    %c4_i32 = arith.constant 4 : i32
    %30 = vector.broadcast %c4_i32 : i32 to vector<8x128xi32>
    %31 = arith.cmpi slt, %29, %30 : vector<8x128xi32>
    %32 = arith.select %31, %28, %17 : vector<8x128xi1>, vector<8x128xf32>
    %c0_21 = arith.constant 0 : index
    %c0_22 = arith.constant 0 : index
    %33 = vector.load %arg9[%c0_21, %c0_22] : memref<8x128xf32, #tpu.memory_space<vmem>>, vector<8x128xf32>
    tpu.vector_store %arg9[%c0_21, %c0_22], %32 {strides = array<i32>} : memref<8x128xf32, #tpu.memory_space<vmem>>, vector<8x128xf32>,
    return
  }
  func.func @transform_0(%arg0: i32) -> (i32, i32) {
    %c0_i32 = arith.constant 0 : i32
    %c0_i32_0 = arith.constant 0 : i32
    return %arg0, %c0_i32 : i32, i32
  }
  func.func @transform_1(%arg0: i32) -> (i32, i32) {
    %c0_i32 = arith.constant 0 : i32
    %c0_i32_0 = arith.constant 0 : i32
    %c0_i32_1 = arith.constant 0 : i32
    return %c0_i32, %c0_i32_0 : i32, i32
  }
  func.func @transform_2(%arg0: i32) -> (i32, i32) {
    %c0_i32 = arith.constant 0 : i32
    %c0_i32_0 = arith.constant 0 : i32
    %c0_i32_1 = arith.constant 0 : i32
    return %c0_i32, %c0_i32_0 : i32, i32
  }
  func.func @transform_3(%arg0: i32) -> (i32, i32) {
    %c0_i32 = arith.constant 0 : i32
    %c0_i32_0 = arith.constant 0 : i32
    %c0_i32_1 = arith.constant 0 : i32
    return %c0_i32, %c0_i32_0 : i32, i32
  }
  func.func @transform_4(%arg0: i32) -> (i32, i32) {
    %c0_i32 = arith.constant 0 : i32
    %c0_i32_0 = arith.constant 0 : i32
    %c0_i32_1 = arith.constant 0 : i32
    return %c0_i32, %c0_i32_0 : i32, i32
  }
  func.func @transform_5(%arg0: i32) -> (i32, i32) {
    %c0_i32 = arith.constant 0 : i32
    %c0_i32_0 = arith.constant 0 : i32
    %c0_i32_1 = arith.constant 0 : i32
    return %c0_i32, %c0_i32_0 : i32, i32
  }
  func.func @transform_6(%arg0: i32) -> (i32, i32) {
    %c0_i32 = arith.constant 0 : i32
    %c0_i32_0 = arith.constant 0 : i32
    %c0_i32_1 = arith.constant 0 : i32
    return %c0_i32, %c0_i32_0 : i32, i32
  }
  func.func @transform_7(%arg0: i32) -> (i32, i32) {
    %c0_i32 = arith.constant 0 : i32
    %c0_i32_0 = arith.constant 0 : i32
    %c0_i32_1 = arith.constant 0 : i32
    return %c0_i32, %c0_i32_0 : i32, i32
  }
  func.func @transform_8(%arg0: i32) -> (i32, i32) {
    %c0_i32 = arith.constant 0 : i32
    %c0_i32_0 = arith.constant 0 : i32
    return %arg0, %c0_i32 : i32, i32
  }
}

</mosaic_0001>

<bundles_post_ra>
// kernel: actor_critic_evaluate.1
= control target key start
LH: loop header
LB: loop body
LE: loop exit
PB: predicated region body
PF: predicated region fallthrough
CT: control target
= control target key end

     0   :  { %13 = vsyncpa [#allocation3], 0  ;;  %s924_s0 = inlined_call_operand.vmem [shape: f32[8,24], index: 0, kind: input, shape index: {}]   ;;  %s925_s1 = inlined_call_operand.hbm [shape: f32[24,128], index: 1, kind: input, shape index: {}]   ;;  %s926_s2 = inlined_call_operand.vmem [shape: f32[1,128], index: 2, kind: input, shape index: {}]   ;;  %s927_s3 = inlined_call_operand.hbm [shape: f32[128,128], index: 3, kind: input, shape index: {}]   ;;  %s928_s4 = inlined_call_operand.vmem [shape: f32[1,128], index: 4, kind: input, shape index: {}]   ;;  %s929_s5 = inlined_call_operand.hbm [shape: f32[128,128], index: 5, kind: input, shape index: {}]   ;;  %s930_s6 = inlined_call_operand.vmem [shape: f32[1,128], index: 6, kind: input, shape index: {}]   ;;  %s931_s7 = inlined_call_operand.hbm [shape: f32[24,128], index: 7, kind: input, shape index: {}]   ;;  %s932_s8 = inlined_call_operand.vmem [shape: f32[8,128], index: 8, kind: output, shape index: {}]  }
   0x1   :  { %14 = vsyncpa [#allocation5], 0 }
   0x2   :  { %15 = vsyncpa [#allocation8], 0  ;;  %s747_s27 = smov [#allocation4]   ;;  %s748_s29 = smov [#allocation2]  }
   0x3   :  { %s37_s28 = sshll.u32 %s747_s27, 4  ;;  %s23_s30 = sshll.u32 %s748_s29, 4  ;;  %s38_s28 = int_to_ptr.vmem [resolvable:$true] %s37_s28  ;;  %s801_s30 = int_to_ptr.vmem [resolvable:$true] %s23_s30 }
   0x4   :  { %s653_s11 = scalar_lea.hbm %s927_s3, 2048 }
   0x5   :  { %p654_p0 = scmp.ne.s32.totalorder %s927_s3, %s653_s11  ;;  %p657_p1 = scmp.lt.u32.totalorder %s653_s11, %s927_s3 }
   0x7   :  { %p659_p2 = pnand %p657_p1, %p654_p0 }
   0x9   :  { %662 = shalt.err (!%p659_p2)
}
   0xa   :  { %s663_s16 = scalar_lea.vmem %s38_s28, 2048  ;;  %p668_p4 = scmp.lt.s32.totalorder %s38_s28, %s38_s28 }
   0xb   :  { %p664_p3 = scmp.ne.s32.totalorder %s38_s28, %s663_s16  ;;  %p669_p5 = scmp.lt.s32.totalorder %s663_s16, %s663_s16 }
   0xd   :  { %p670_p6 = por %p669_p5, %p668_p4 }
   0xf   :  { %p671_p7 = pnand %p670_p6, %p664_p3 }
  0x11   :  { %674 = shalt.err (!%p671_p7)
}
  0x12   :  { %s749_s17 = smov 128   ;;  %s750_s18 = smov 8  }
  0x13   :  { %43 = dma.hbm_to_vmem [thread:$0]  %s927_s3, 2048, %s38_s28, [#allocation5], %s749_s17, %s749_s17, %s750_s18  }
  0x14   :  { %s675_s23 = scalar_lea.hbm %s925_s1, 384 }
  0x15   :  { %p676_p8 = scmp.ne.s32.totalorder %s925_s1, %s675_s23  ;;  %p679_p9 = scmp.lt.u32.totalorder %s675_s23, %s925_s1 }
  0x17   :  { %p681_p10 = pnand %p679_p9, %p676_p8 }
  0x19   :  { %684 = shalt.err (!%p681_p10)
}
  0x1a   :  { %s685_s29 = scalar_lea.vmem %s801_s30, 384  ;;  %p690_p12 = scmp.lt.s32.totalorder %s801_s30, %s801_s30 }
  0x1b   :  { %p686_p11 = scmp.ne.s32.totalorder %s801_s30, %s685_s29  ;;  %p691_p13 = scmp.lt.s32.totalorder %s685_s29, %s685_s29 }
  0x1d   :  { %p692_p0 = por %p691_p13, %p690_p12 }
  0x1f   :  { %p693_p1 = pnand %p692_p0, %p686_p11 }
  0x21   :  { %696 = shalt.err (!%p693_p1)
}
  0x22   :  { %29 = dma.hbm_to_vmem [thread:$0]  %s925_s1, 384, %s801_s30, [#allocation3], %s749_s17, %s749_s17, %s750_s18  }
  0x23   :  { %s751_s9 = smov [#allocation6]   ;;  %s752_s11 = smov [#allocation7]  }
  0x24   :  { %s51_s10 = sshll.u32 %s751_s9, 4  ;;  %s65_s12 = sshll.u32 %s752_s11, 4  ;;  %s52_s10 = int_to_ptr.vmem [resolvable:$true] %s51_s10  ;;  %s838_s12 = int_to_ptr.vmem [resolvable:$true] %s65_s12 }
  0x25   :  { %s697_s15 = scalar_lea.hbm %s929_s5, 2048 }
  0x26   :  { %p698_p2 = scmp.ne.s32.totalorder %s929_s5, %s697_s15  ;;  %p701_p3 = scmp.lt.u32.totalorder %s697_s15, %s929_s5 }
  0x28   :  { %p703_p4 = pnand %p701_p3, %p698_p2 }
  0x2a   :  { %706 = shalt.err (!%p703_p4)
}
  0x2b   :  { %s707_s1 = scalar_lea.vmem %s52_s10, 2048  ;;  %p712_p6 = scmp.lt.s32.totalorder %s52_s10, %s52_s10 }
  0x2c   :  { %p708_p5 = scmp.ne.s32.totalorder %s52_s10, %s707_s1  ;;  %p713_p7 = scmp.lt.s32.totalorder %s707_s1, %s707_s1 }
  0x2e   :  { %p714_p8 = por %p713_p7, %p712_p6 }
  0x30   :  { %p715_p9 = pnand %p714_p8, %p708_p5 }
  0x32   :  { %718 = shalt.err (!%p715_p9)
}
  0x33   :  { %57 = dma.hbm_to_vmem [thread:$0]  %s929_s5, 2048, %s52_s10, [#allocation5], %s749_s17, %s749_s17, %s750_s18  }
  0x34   :  { %s719_s25 = scalar_lea.hbm %s931_s7, 384 }
  0x35   :  { %p720_p10 = scmp.ne.s32.totalorder %s931_s7, %s719_s25  ;;  %p723_p11 = scmp.lt.u32.totalorder %s719_s25, %s931_s7 }
  0x37   :  { %p725_p12 = pnand %p723_p11, %p720_p10 }
  0x39   :  { %728 = shalt.err (!%p725_p12)
}
  0x3a   :  { %s729_s28 = scalar_lea.vmem %s838_s12, 384  ;;  %p734_p0 = scmp.lt.s32.totalorder %s838_s12, %s838_s12 }
  0x3b   :  { %p730_p13 = scmp.ne.s32.totalorder %s838_s12, %s729_s28  ;;  %p735_p1 = scmp.lt.s32.totalorder %s729_s28, %s729_s28 }
  0x3d   :  { %p736_p2 = por %p735_p1, %p734_p0 }
  0x3f   :  { %p737_p3 = pnand %p736_p2, %p730_p13 }
  0x41   :  { %740 = shalt.err (!%p737_p3)
}
  0x42   :  { %71 = dma.hbm_to_vmem [thread:$0]  %s931_s7, 384, %s838_s12, [#allocation8], %s749_s17, %s749_s17, %s750_s18  }
  0x43   :  { %741 = dma.done.wait [#allocation3], 384  }
  0x44   :  { %742 = vsyncadd [#allocation3], 4294966912 }
  0x45   :  { %743 = dma.done.wait [#allocation5], 4096  }
  0x46   :  { %744 = vsyncadd [#allocation5], 4294963200 }
  0x47   :  { %745 = dma.done.wait [#allocation8], 384  }
  0x48   :  { %746 = vsyncadd [#allocation8], 4294966912  ;;  %v753_v0 = vmov 0.0|0.0   ;;  %vm754_vm0 = vmmov 0   ;;  %v755_v1 = vmov 0.0   ;;  %v85_v2 = vld [vmem:[#allocation2] sm:$0xff] }
  0x49   :  { %584 = vmatprep.subr.bf16.mxu0 %v753_v0  ;;  %502 = vmatprep.mubr.msk.f32.mxu0 %vm754_vm0, %v755_v1  ;;  %v86_v3 = vld [vmem:[#allocation2 + $0x8] sm:$0xff]  ;;  %v170_v5 = vld [vmem:[#allocation4] sm:$0xff]  ;;  %v171_v6 = vld [vmem:[#allocation4 + $0x8] sm:$0xff]  ;;  %vm95_vm1 = vcmask 195584  }
  0x4a   :  { %587 = vmatprep.subr.bf16.mxu1 %v753_v0  ;;  %537 = vmatprep.mubr.msk.f32.mxu1 %vm754_vm0, %v755_v1  ;;  %v585_v4 = vpack.c.bf16 %v86_v3, %v85_v2  ;;  %v588_v7 = vpack.c.bf16 %v171_v6, %v170_v5  ;;  %v172_v8 = vld [vmem:[#allocation4 + $0x10] sm:$0xff]  ;;  %v173_v9 = vld [vmem:[#allocation4 + $0x18] sm:$0xff]  ;;  %v885_v12 = vld [vmem:[%s924_s0] sm:$0xff] }
  0x4b   :  { %v87_v10 = vld [vmem:[#allocation2 + $0x10] sm:$0xff]  ;;  %v591_v11 = vpack.c.bf16 %v173_v9, %v172_v8  ;;  %v174_v13 = vld [vmem:[#allocation4 + $0x20] sm:$0xff]  ;;  %v175_v14 = vld [vmem:[#allocation4 + $0x28] sm:$0xff] }
  0x4c   :  { %586 = vmatpush3.bf16.msra.mxu0 %v585_v4  ;;  %589 = vmatpush3.bf16.msra.mxu1 %v588_v7  ;;  %v594_v15 = vpack.c.bf16 %v175_v14, %v174_v13  ;;  %v176_v16 = vld [vmem:[#allocation4 + $0x30] sm:$0xff]  ;;  %v177_v17 = vld [vmem:[#allocation4 + $0x38] sm:$0xff]  ;;  %v178_v19 = vld [vmem:[#allocation4 + $0x40] sm:$0xff] }
  0x4d   :  { %500 = vmatprep.subr.mxu0 %v755_v1  ;;  %590 = vmatprep.subr.bf16.mxu1 %v753_v0  ;;  %v597_v18 = vpack.c.bf16 %v177_v17, %v176_v16  ;;  %v179_v20 = vld [vmem:[#allocation4 + $0x48] sm:$0xff]  ;;  %v180_v22 = vld [vmem:[#allocation4 + $0x50] sm:$0xff]  ;;  %v181_v23 = vld [vmem:[#allocation4 + $0x58] sm:$0xff] }
  0x4e   :  { %v600_v21 = vpack.c.bf16 %v179_v20, %v178_v19  ;;  %v603_v24 = vpack.c.bf16 %v181_v23, %v180_v22  ;;  %v182_v25 = vld [vmem:[#allocation4 + $0x60] sm:$0xff]  ;;  %v183_v26 = vld [vmem:[#allocation4 + $0x68] sm:$0xff]  ;;  %v184_v28 = vld [vmem:[#allocation4 + $0x70] sm:$0xff] }
  0x4f   :  { %v606_v27 = vpack.c.bf16 %v183_v26, %v182_v25  ;;  %v185_v29 = vld [vmem:[#allocation4 + $0x78] sm:$0xff]  ;;  %v264_v31 = vld [vmem:[#allocation6] sm:$0xff]  ;;  %v265_v32 = vld [vmem:[#allocation6 + $0x8] sm:$0xff] }
  0x50   :  { %501 = vmatpush3.msra.mxu0 %v87_v10  ;;  %592 = vmatpush3.bf16.msra.mxu1 %v591_v11  ;;  %v609_v30 = vpack.c.bf16 %v185_v29, %v184_v28  ;;  %v266_v33 = vld [vmem:[#allocation6 + $0x10] sm:$0xff]  ;;  %v612_v34 = vpack.c.bf16 %v265_v32, %v264_v31  ;;  %v267_v35 = vld [vmem:[#allocation6 + $0x18] sm:$0xff]  ;;  %v268_v37 = vld [vmem:[#allocation6 + $0x20] sm:$0xff] }
  0x51   :  { %503 = vmatmul.mubr.msk.f32.vlgmr.msra.gmra.mrb[0].mxu0 %vm95_vm1, %v885_v12  ;;  %593 = vmatprep.subr.bf16.mxu1 %v753_v0  ;;  %v615_v36 = vpack.c.bf16 %v267_v35, %v266_v33  ;;  %v269_v38 = vld [vmem:[#allocation6 + $0x28] sm:$0xff]  ;;  %v270_v40 = vld [vmem:[#allocation6 + $0x30] sm:$0xff]  ;;  %v271_v41 = vld [vmem:[#allocation6 + $0x38] sm:$0xff] }
  0x52   :  { %611 = vmatprep.subr.bf16.mxu0 %v753_v0  ;;  %572 = vmatprep.mubr.msk.f32.mxu0 %vm754_vm0, %v755_v1  ;;  %v618_v39 = vpack.c.bf16 %v269_v38, %v268_v37  ;;  %v621_v42 = vpack.c.bf16 %v271_v41, %v270_v40  ;;  %v272_v43 = vld [vmem:[#allocation6 + $0x40] sm:$0xff]  ;;  %v273_v44 = vld [vmem:[#allocation6 + $0x48] sm:$0xff]  ;;  %v274_v51 = vld [vmem:[#allocation6 + $0x50] sm:$0xff] }
  0x53   :  { %613 = vmatpush3.bf16.msra.mxu0 %v612_v34  ;;  %v624_v45 = vpack.c.bf16 %v273_v44, %v272_v43  ;;  %v448_v46 = vld [vmem:[%s926_s2] ss:$0 sm:$0xff]  ;;  %v275_v52 = vld [vmem:[#allocation6 + $0x58] sm:$0xff]  ;;  %v276_v54 = vld [vmem:[#allocation6 + $0x60] sm:$0xff] }
  0x54   :  { %595 = vmatpush3.bf16.msra.mxu1 %v594_v15  ;;  %614 = vmatprep.subr.bf16.mxu0 %v753_v0  ;;  %v627_v53 = vpack.c.bf16 %v275_v52, %v274_v51  ;;  %v277_v55 = vld [vmem:[#allocation6 + $0x68] sm:$0xff]  ;;  %v278_v57 = vld [vmem:[#allocation6 + $0x70] sm:$0xff]  ;;  %v279_v58 = vld [vmem:[#allocation6 + $0x78] sm:$0xff] }
  0x55   :  { %596 = vmatprep.subr.bf16.mxu1 %v753_v0  ;;  %v630_v56 = vpack.c.bf16 %v277_v55, %v276_v54  ;;  %v633_v59 = vpack.c.bf16 %v279_v58, %v278_v57  ;;  %v358_v60 = vld [vmem:[#allocation7] sm:$0xff]  ;;  %v359_v61 = vld [vmem:[#allocation7 + $0x8] sm:$0xff]  ;;  %v360_v63 = vld [vmem:[#allocation7 + $0x10] sm:$0xff] }
  0x56   :  { %v636_v62 = vpack.c.bf16 %v359_v61, %v358_v60  ;;  %v450_v2 = vld [vmem:[%s928_s4] ss:$0 sm:$0xff] }
  0x57   :  { %616 = vmatpush3.bf16.msra.mxu0 %v615_v36 }
  0x58   :  { %598 = vmatpush3.bf16.msra.mxu1 %v597_v18  ;;  %617 = vmatprep.subr.bf16.mxu0 %v753_v0 }
  0x59   :  { %599 = vmatprep.subr.bf16.mxu1 %v753_v0 }
  0x5b   :  { %619 = vmatpush3.bf16.msra.mxu0 %v618_v39 }
  0x5c   :  { %601 = vmatpush3.bf16.msra.mxu1 %v600_v21  ;;  %620 = vmatprep.subr.bf16.mxu0 %v753_v0 }
  0x5d   :  { %602 = vmatprep.subr.bf16.mxu1 %v753_v0 }
  0x5f   :  { %622 = vmatpush3.bf16.msra.mxu0 %v621_v42 }
  0x60   :  { %604 = vmatpush3.bf16.msra.mxu1 %v603_v24  ;;  %623 = vmatprep.subr.bf16.mxu0 %v753_v0 }
  0x61   :  { %605 = vmatprep.subr.bf16.mxu1 %v753_v0 }
  0x63   :  { %625 = vmatpush3.bf16.msra.mxu0 %v624_v45 }
  0x64   :  { %607 = vmatpush3.bf16.msra.mxu1 %v606_v27  ;;  %626 = vmatprep.subr.bf16.mxu0 %v753_v0 }
  0x65   :  { %608 = vmatprep.subr.bf16.mxu1 %v753_v0 }
  0x67   :  { %628 = vmatpush3.bf16.msra.mxu0 %v627_v53 }
  0x68   :  { %610 = vmatpush3.bf16.msra.mxu1 %v609_v30  ;;  %629 = vmatprep.subr.bf16.mxu0 %v753_v0 }
  0x69   :  { %635 = vmatprep.subr.bf16.mxu1 %v753_v0 }
  0x6b   :  { %631 = vmatpush3.bf16.msra.mxu0 %v630_v56 }
  0x6c   :  { %632 = vmatprep.subr.bf16.mxu0 %v753_v0 }
  0x6f   :  { %634 = vmatpush3.bf16.msra.mxu0 %v633_v59 }
 0x124   :  { %v165_v47 = vpop.f32.mrb[0].mxu0 }
 0x125   :  { %v166_v48 = vadd.f32 %v448_v46, %v165_v47  ;;  %v504_v49 = vpop.f32.mrb[1].mxu0 }
 0x127   :  { %647 = vtanh.f32 %v166_v48 }
 0x131   :  { %v648_v50 = vpop.eup %647 }
 0x132   :  { %538 = vmatmul.mubr.f32.vlgmr.msra.gmra.mrb[0].mxu1 %v648_v50 }
 0x133   :  { %581 = vmatprep.mubr.msk.f32.mxu1 %vm754_vm0, %v755_v1  ;;  %637 = vmatpush3.bf16.msra.mxu1 %v636_v62 }
 0x134   :  { %579 = vmatprep.subr.mxu1 %v755_v1  ;;  %v451_v1 = vld [vmem:[%s930_s6] ss:$0 sm:$0xff] }
 0x137   :  { %580 = vmatpush3.msra.mxu1 %v360_v63 }
 0x138   :  { %582 = vmatmul.mubr.msk.f32.vlgmr.msra.gmra.mrb[2].mxu1 %vm95_vm1, %v885_v12  ;;  %v436_v12 = vlaneseq }
 0x13a   :  { %v437_v15 = vand.u32 127, %v436_v12 }
 0x13c   :  { %vm438_vm2 = vcmp.lt.s32.totalorder %v437_v15, 4 }
 0x205   :  { %v259_v3 = vpop.f32.mrb[0].mxu1 }
 0x206   :  { %v260_v4 = vadd.f32 %v450_v2, %v259_v3  ;;  %v539_v5 = vpop.f32.mrb[1].mxu1 }
 0x208   :  { %649 = vtanh.f32 %v260_v4 }
 0x20b   :  { %v427_v6 = vpop.f32.mrb[2].mxu1 }
 0x20c   :  { %v583_v7 = vpop.f32.mrb[3].mxu1 }
 0x212   :  { %v650_v0 = vpop.eup %649 }
 0x213   :  { %573 = vmatmul.mubr.f32.vlgmr.msra.gmra.mrb[2].mxu0 %v650_v0 }
 0x2e6   :  { %v353_v8 = vpop.f32.mrb[2].mxu0 }
 0x2e7   :  { %v354_v9 = vadd.f32 %v451_v1, %v353_v8  ;;  %v574_v10 = vpop.f32.mrb[3].mxu0 }
 0x2e9   :  { %651 = vtanh.f32 %v354_v9 }
 0x2f3   :  { %v652_v11 = vpop.eup %651 }
 0x2f4   :  { %v431_v13 = vsub.f32 %v427_v6, %v652_v11 }
 0x2f6   :  { %v432_v14 = vmul.f32 2.0, %v431_v13 }
 0x2f8   :  { %v433_v16 = vmul.f32 -0.5, %v432_v14 }
 0x2fa   :  { %v434_v17 = vmul.f32 %v433_v16, %v432_v14 }
 0x2fc   :  { %v453_v18 = vadd.f32 -0.22579135, %v434_v17 }
 0x2fe   :  { %v439_v19 = vsel %vm438_vm2, %v453_v18, %v354_v9 }
 0x2ff   :  { %440 = vst [vmem:[%s932_s8] sm:$0xff] %v439_v19 }
 0x300   :  { %445 = vsyncpa [#allocation3], 1 }
 0x301   :  { %446 = vsyncpa [#allocation5], 1 }
 0x302   :  { %447 = vsyncpa [#allocation8], 1 }

</bundles_post_ra>
